<compile_context>
chip_gen: v6e
topology: v6e:2x2x1
jax: 0.10.0
libtpu: 0.0.40
codegen_flags: <defaults>
</compile_context>

<pallas_src>
import functools

import jax
import jax.numpy as jnp
from jax import lax
from jax.experimental import pallas as pl
from jax.experimental.pallas import tpu as pltpu


def _round_up(x, m):
    return ((x + m - 1) // m) * m


# ---------------------------------------------------------------------------
# Kernels
# ---------------------------------------------------------------------------
def _delta_block(gt_ref, est_ref, *, img_h, valid_w):
    """4 * (delta_x + delta_y) for one (R, Wp) block.  The two 0.5 Sobel taps
    are folded into a single 0.25 factor applied by the caller."""
    gt = gt_ref[...].astype(jnp.float32)
    est = est_ref[...].astype(jnp.float32)
    r, wp = gt.shape
    lane_padded = valid_w != wp

    # Narrow-shape boundary masks as float 0/1 factors; iota / modulo /
    # compare happen at (r, 1) and (1, wp) and broadcast at the multiply.
    row = lax.broadcasted_iota(jnp.int32, (r, 1), 0)
    row_in = row if r == img_h else row % img_h          # row index in image
    keep_d = (row_in < (img_h - 1)).astype(jnp.float32)  # has a row below
    keep_u = (row_in > 0).astype(jnp.float32)            # has a row above

    if lane_padded:
        # Pad columns are the conv's zero padding: the right neighbour of
        # column w-1 and the wrapped left neighbour of column 0 are both pad
        # zeros; the only bad column (wp-1 wrapping to column 0) is removed
        # by the final `col < valid_w` mask below.
        def grad_x(x):
            return jnp.abs(pltpu.roll(x, shift=wp - 1, axis=1)
                           - pltpu.roll(x, shift=1, axis=1))
    else:
        col = lax.broadcasted_iota(jnp.int32, (1, wp), 1)
        keep_r = (col < (wp - 1)).astype(jnp.float32)
        keep_l = (col > 0).astype(jnp.float32)

        def grad_x(x):
            return jnp.abs(pltpu.roll(x, shift=wp - 1, axis=1) * keep_r
                           - pltpu.roll(x, shift=1, axis=1) * keep_l)

    def grad_y(x):
        # Sublane roll wraps across image boundaries inside the block, but
        # those rows are exactly the masked first/last rows of each image.
        return jnp.abs(pltpu.roll(x, shift=r - 1, axis=0) * keep_d
                       - pltpu.roll(x, shift=1, axis=0) * keep_u)

    dx = grad_x(gt) - grad_x(est)
    dy = grad_y(gt) - grad_y(est)
    delta = dx * dx + dy * dy
    if lane_padded:
        col = lax.broadcasted_iota(jnp.int32, (1, wp), 1)
        delta = delta * (col < valid_w).astype(jnp.float32)
    return delta


def _gradient_sum_kernel(gt_ref, est_ref, out_ref, *, img_h, valid_w):
    # out_ref: (1, Wp) lane-dense partial sum for this grid step.
    delta = _delta_block(gt_ref, est_ref, img_h=img_h, valid_w=valid_w)
    out_ref[...] = jnp.sum(delta, axis=0, keepdims=True)


def _gradient_map_kernel(gt_ref, est_ref, out_ref, *, img_h, valid_w):
    # out_ref: (R, Wp) per-pixel map (pad columns sliced off by the wrapper).
    delta = _delta_block(gt_ref, est_ref, img_h=img_h, valid_w=valid_w)
    out_ref[...] = (jnp.float32(0.25) * delta).astype(out_ref.dtype)


# ---------------------------------------------------------------------------
# Tiling / VMEM helpers
# ---------------------------------------------------------------------------
def _vmem_capacity_bytes():
    try:
        cap = getattr(pltpu.get_tpu_info(), "vmem_capacity_bytes", None)
        if cap:
            return int(cap)
    except Exception:
        pass
    return 64 * 1024 * 1024  # conservative default (v7x physical VMEM / TC)


def _block_budget_bytes(vmem_cap):
    # Bigger blocks amortise the ~0.35 us/step grid overhead on 128 MiB parts
    # (v5e/v6e); stay conservative on 64 MiB parts (v7x).
    return 4 * 1024 * 1024 if vmem_cap >= 100 * 1024 * 1024 else 2 * 1024 * 1024


def _vmem_tile_bytes(rows, cols, dtype):
    itemsize = jnp.dtype(dtype).itemsize
    sub = max(32 // itemsize, 1)  # sublane granule: 8 for f32, 16 for bf16
    return _round_up(rows, sub) * _round_up(cols, 128) * itemsize


def _choose_batch_tile(n, h, wp, itemsize, budget_bytes):
    """Images per grid step: fit the per-input block budget, divide N, keep
    the sublane block dim a multiple of 8 (or the full array), and keep at
    least two grid steps so both v7x TensorCores get work."""
    per_image_bytes = max(h * _round_up(wp, 128) * itemsize, 1)
    tb_cap = max(1, min(n, budget_bytes // per_image_bytes))

    def legal(tb):
        return n % tb == 0 and ((tb * h) % 8 == 0 or tb == n)

    for tb in range(tb_cap, 0, -1):  # within budget, >= 2 grid steps
        if legal(tb) and (n // tb >= 2 or n == 1):
            return tb
    for tb in range(tb_cap, 0, -1):  # within budget, any legal tile
        if legal(tb):
            return tb
    # Whole-batch fallback (only needed when H % 8 != 0 and no batch multiple
    # fixes it); may exceed the budget for very large images.
    # TODO(synk): tile H with a 1-row halo instead of whole-batch blocks.
    return n


# ---------------------------------------------------------------------------
# Public wrapper
# ---------------------------------------------------------------------------
def gradient_loss(gt, est, reduction="mean"):
    """Pallas equivalent of GradientLoss(reduction=...)(gt, est)."""
    if reduction not in ("mean", "sum", "none"):
        raise ValueError(f"unsupported reduction: {reduction!r}")
    if gt.shape != est.shape or gt.ndim != 4 or gt.shape[1] != 1:
        raise ValueError("expected matching NCHW inputs with C == 1")
    n, _, h, w = gt.shape
    itemsize = jnp.dtype(gt.dtype).itemsize

    # Lane-dense width.  The zero pad is exactly the conv's zero padding;
    # allow_input_fusion lets XLA fuse the reshape/pad into the pallas_call
    # inputs instead of a separate HBM round trip.
    wp = _round_up(w, 128)
    gt2 = gt.reshape(n * h, w)
    est2 = est.reshape(n * h, w)
    if wp != w:
        gt2 = jnp.pad(gt2, ((0, 0), (0, wp - w)))
        est2 = jnp.pad(est2, ((0, 0), (0, wp - w)))

    vmem_cap = _vmem_capacity_bytes()
    tb = _choose_batch_tile(n, h, wp, itemsize, _block_budget_bytes(vmem_cap))
    steps = n // tb
    r = tb * h

    in_block = _vmem_tile_bytes(r, wp, gt.dtype)
    f32_block = _vmem_tile_bytes(r, wp, jnp.float32)

    def make_compiler_params(out_block):
        need = (2 * 2 * in_block      # two inputs, double-buffered by Pallas
                + 2 * out_block       # output, double-buffered
                + 8 * f32_block       # f32 cast / roll / delta temporaries
                + 2 * 1024 * 1024)    # Mosaic internal scratch headroom
        lo = 16 * 1024 * 1024
        hi = max(lo, (vmem_cap * 3) // 4)
        return pltpu.CompilerParams(
            dimension_semantics=("parallel",),
            vmem_limit_bytes=int(min(max(need, lo), hi)),
            allow_input_fusion=[True, True] if wp != w else None,
        )

    in_specs = [pl.BlockSpec((r, wp), lambda b: (b, 0)),
                pl.BlockSpec((r, wp), lambda b: (b, 0))]
    flops = 24 * n * h * w
    in_bytes = 2 * n * h * wp * itemsize

    if reduction == "none":
        full = pl.pallas_call(
            functools.partial(_gradient_map_kernel, img_h=h, valid_w=w),
            out_shape=jax.ShapeDtypeStruct((n * h, wp), jnp.float32),
            grid_spec=pltpu.PrefetchScalarGridSpec(
                num_scalar_prefetch=0,
                grid=(steps,),
                in_specs=in_specs,
                out_specs=pl.BlockSpec((r, wp), lambda b: (b, 0)),
            ),
            compiler_params=make_compiler_params(f32_block),
            cost_estimate=pl.CostEstimate(
                flops=flops, transcendentals=0,
                bytes_accessed=in_bytes + n * h * wp * 4),
        )(gt2, est2)
        if wp != w:
            full = full[:, :w]
        return full.reshape(n, 1, h, w)

    out_block = _vmem_tile_bytes(1, wp, jnp.float32)
    partials = pl.pallas_call(
        functools.partial(_gradient_sum_kernel, img_h=h, valid_w=w),
        out_shape=jax.ShapeDtypeStruct((steps, 1, wp), jnp.float32),
        grid_spec=pltpu.PrefetchScalarGridSpec(
            num_scalar_prefetch=0,
            grid=(steps,),
            in_specs=in_specs,
            out_specs=pl.BlockSpec((None, 1, wp), lambda b: (b, 0, 0)),
        ),
        compiler_params=make_compiler_params(out_block),
        cost_estimate=pl.CostEstimate(
            flops=flops, transcendentals=0,
            bytes_accessed=in_bytes + steps * wp * 4),
    )(gt2, est2)

    # 0.25 folds the two 0.5 Sobel scales removed inside the kernel.
    total = jnp.float32(0.25) * jnp.sum(partials)
    if reduction == "sum":
        return total
    return total / jnp.float32(n * h * w)  # 'mean'


# ---------------------------------------------------------------------------
# Pure-JAX reference (replicates F.conv2d(..., padding=1) with the Sobel taps)
# ---------------------------------------------------------------------------
def _reference(gt, est, reduction="mean"):
    def conv_grads(x):
        x = x.astype(jnp.float32)
        xpad = jnp.pad(x, ((0, 0), (0, 0), (1, 1), (1, 1)))
        gx = 0.5 * xpad[:, :, 1:-1, 2:] - 0.5 * xpad[:, :, 1:-1, :-2]
        gy = 0.5 * xpad[:, :, 2:, 1:-1] - 0.5 * xpad[:, :, :-2, 1:-1]
        return jnp.abs(gx), jnp.abs(gy)

    ggx, ggy = conv_grads(gt)
    gex, gey = conv_grads(est)
    d = (ggx - gex) ** 2 + (ggy - gey) ** 2
    if reduction == "none":
        return d
    if reduction == "sum":
        return jnp.sum(d)
    return jnp.mean(d)


if __name__ == "__main__":
    key = jax.random.PRNGKey(0)

    cases = [
        ((2, 1, 16, 16), jnp.float32, "mean"),    # module default
        ((2, 1, 16, 16), jnp.float32, "sum"),
        ((2, 1, 16, 16), jnp.float32, "none"),    # per-pixel map
        ((4, 1, 12, 20), jnp.float32, "mean"),    # H % 8 != 0, multi-image block
        ((2, 1, 8, 128), jnp.float32, "mean"),    # W % 128 == 0 (unpadded path)
        ((2, 1, 16, 16), jnp.bfloat16, "sum"),    # bf16 inputs
    ]
    for shape, dtype, reduction in cases:
        key, k1, k2 = jax.random.split(key, 3)
        gt = jax.random.normal(k1, shape, dtype=jnp.float32).astype(dtype)
        est = jax.random.normal(k2, shape, dtype=jnp.float32).astype(dtype)

        got = jax.block_until_ready(gradient_loss(gt, est, reduction=reduction))
        want = _reference(gt.astype(jnp.float32), est.astype(jnp.float32),
                          reduction=reduction)

        got32 = jnp.asarray(got, dtype=jnp.float32)
        want32 = jnp.asarray(want, dtype=jnp.float32)
        err = float(jnp.max(jnp.abs(got32 - want32)))
        scale = float(jnp.max(jnp.abs(want32))) + 1e-6
        assert err <= 1e-4 * scale + 1e-6, (shape, str(dtype), reduction, err, scale)

    print("KERNEL_OK")
</pallas_src>

<mosaic_0001>
module attributes {stable_mosaic.version = 11 : i64} {
  func.func @_gradient_sum_kernel(%arg0: i32, %arg1: memref<16x128xf32, #tpu.memory_space<vmem>>, %arg2: memref<16x128xf32, #tpu.memory_space<vmem>>, %arg3: memref<1x1x128xf32, #tpu.memory_space<vmem>>) attributes {dimension_semantics = [#tpu.dimension_semantics<parallel>], iteration_bounds = array<i64: 2>, scalar_prefetch = 0 : i64, scratch_operands = 0 : i64, tpu.core_type = #tpu.core_type<tc>, window_params = [{transform_indices = @transform_0, window_bounds = array<i64: 16, 128>}, {transform_indices = @transform_1, window_bounds = array<i64: 16, 128>}, {transform_indices = @transform_2, window_bounds = array<i64: 1, 1, 128>}]} {
    %c0 = arith.constant 0 : index
    %c0_0 = arith.constant 0 : index
    %0 = vector.load %arg1[%c0, %c0_0] : memref<16x128xf32, #tpu.memory_space<vmem>>, vector<16x128xf32>
    %c0_1 = arith.constant 0 : index
    %c0_2 = arith.constant 0 : index
    %1 = vector.load %arg2[%c0_1, %c0_2] : memref<16x128xf32, #tpu.memory_space<vmem>>, vector<16x128xf32>
    %2 = tpu.iota {dimensions = array<i32: 0>} : vector<16x1xi32>
    %c15_i32 = arith.constant 15 : i32
    %3 = vector.broadcast %c15_i32 : i32 to vector<16x1xi32>
    %4 = arith.cmpi slt, %2, %3 : vector<16x1xi32>
    %5 = arith.extui %4 : vector<16x1xi1> to vector<16x1xi32>
    %6 = arith.sitofp %5 : vector<16x1xi32> to vector<16x1xf32>
    %c0_i32 = arith.constant 0 : i32
    %7 = vector.broadcast %c0_i32 : i32 to vector<16x1xi32>
    %8 = arith.cmpi sgt, %2, %7 : vector<16x1xi32>
    %9 = arith.extui %8 : vector<16x1xi1> to vector<16x1xi32>
    %10 = arith.sitofp %9 : vector<16x1xi32> to vector<16x1xf32>
    %c127_i32 = arith.constant 127 : i32
    %11 = tpu.dynamic_rotate %0 by %c127_i32 dim 1 : vector<16x128xf32>, i32 -> vector<16x128xf32>
    %c1_i32 = arith.constant 1 : i32
    %12 = tpu.dynamic_rotate %0 by %c1_i32 dim 1 : vector<16x128xf32>, i32 -> vector<16x128xf32>
    %13 = arith.subf %11, %12 : vector<16x128xf32>
    %14 = math.absf %13 : vector<16x128xf32>
    %c127_i32_3 = arith.constant 127 : i32
    %15 = tpu.dynamic_rotate %1 by %c127_i32_3 dim 1 : vector<16x128xf32>, i32 -> vector<16x128xf32>
    %c1_i32_4 = arith.constant 1 : i32
    %16 = tpu.dynamic_rotate %1 by %c1_i32_4 dim 1 : vector<16x128xf32>, i32 -> vector<16x128xf32>
    %17 = arith.subf %15, %16 : vector<16x128xf32>
    %18 = math.absf %17 : vector<16x128xf32>
    %19 = arith.subf %14, %18 : vector<16x128xf32>
    %c15_i32_5 = arith.constant 15 : i32
    %20 = tpu.dynamic_rotate %0 by %c15_i32_5 dim 0 : vector<16x128xf32>, i32 -> vector<16x128xf32>
    %21 = vector.broadcast %6 : vector<16x1xf32> to vector<16x128xf32>
    %22 = arith.mulf %20, %21 : vector<16x128xf32>
    %c1_i32_6 = arith.constant 1 : i32
    %23 = tpu.dynamic_rotate %0 by %c1_i32_6 dim 0 : vector<16x128xf32>, i32 -> vector<16x128xf32>
    %24 = vector.broadcast %10 : vector<16x1xf32> to vector<16x128xf32>
    %25 = arith.mulf %23, %24 : vector<16x128xf32>
    %26 = arith.subf %22, %25 : vector<16x128xf32>
    %27 = math.absf %26 : vector<16x128xf32>
    %c15_i32_7 = arith.constant 15 : i32
    %28 = tpu.dynamic_rotate %1 by %c15_i32_7 dim 0 : vector<16x128xf32>, i32 -> vector<16x128xf32>
    %29 = vector.broadcast %6 : vector<16x1xf32> to vector<16x128xf32>
    %30 = arith.mulf %28, %29 : vector<16x128xf32>
    %c1_i32_8 = arith.constant 1 : i32
    %31 = tpu.dynamic_rotate %1 by %c1_i32_8 dim 0 : vector<16x128xf32>, i32 -> vector<16x128xf32>
    %32 = vector.broadcast %10 : vector<16x1xf32> to vector<16x128xf32>
    %33 = arith.mulf %31, %32 : vector<16x128xf32>
    %34 = arith.subf %30, %33 : vector<16x128xf32>
    %35 = math.absf %34 : vector<16x128xf32>
    %36 = arith.subf %27, %35 : vector<16x128xf32>
    %37 = arith.mulf %19, %19 : vector<16x128xf32>
    %38 = arith.mulf %36, %36 : vector<16x128xf32>
    %39 = arith.addf %37, %38 : vector<16x128xf32>
    %40 = tpu.iota {dimensions = array<i32: 1>} : vector<1x128xi32>
    %c16_i32 = arith.constant 16 : i32
    %41 = vector.broadcast %c16_i32 : i32 to vector<1x128xi32>
    %42 = arith.cmpi slt, %40, %41 : vector<1x128xi32>
    %43 = arith.extui %42 : vector<1x128xi1> to vector<1x128xi32>
    %44 = arith.sitofp %43 : vector<1x128xi32> to vector<1x128xf32>
    %45 = vector.broadcast %44 : vector<1x128xf32> to vector<16x128xf32>
    %46 = arith.mulf %39, %45 : vector<16x128xf32>
    %cst = arith.constant dense<0.000000e+00> : vector<128xf32>
    %47 = vector.multi_reduction <add>, %46, %cst [0] : vector<16x128xf32> to vector<128xf32>
    %48 = vector.shape_cast %47 : vector<128xf32> to vector<1x128xf32>
    %c0_9 = arith.constant 0 : index
    %c0_10 = arith.constant 0 : index
    %c0_11 = arith.constant 0 : index
    %49 = vector.load %arg3[%c0_9, %c0_10, %c0_11] : memref<1x1x128xf32, #tpu.memory_space<vmem>>, vector<1x1x128xf32>
    %50 = vector.shape_cast %49 : vector<1x1x128xf32> to vector<1x128xf32>
    %51 = vector.shape_cast %48 : vector<1x128xf32> to vector<1x1x128xf32>
    tpu.vector_store %arg3[%c0_9, %c0_10, %c0_11], %51 {strides = array<i32>} : memref<1x1x128xf32, #tpu.memory_space<vmem>>, vector<1x1x128xf32>,
    return
  }
  func.func @transform_0(%arg0: i32) -> (i32, i32) {
    %c0_i32 = arith.constant 0 : i32
    %c0_i32_0 = arith.constant 0 : i32
    return %arg0, %c0_i32 : i32, i32
  }
  func.func @transform_1(%arg0: i32) -> (i32, i32) {
    %c0_i32 = arith.constant 0 : i32
    %c0_i32_0 = arith.constant 0 : i32
    return %arg0, %c0_i32 : i32, i32
  }
  func.func @transform_2(%arg0: i32) -> (i32, i32, i32) {
    %c0_i32 = arith.constant 0 : i32
    %c0_i32_0 = arith.constant 0 : i32
    %c0_i32_1 = arith.constant 0 : i32
    return %arg0, %c0_i32, %c0_i32_0 : i32, i32, i32
  }
}

</mosaic_0001>

<bundles_post_ra>
// kernel: tpu_custom_call.1
= control target key start
LH: loop header
LB: loop body
LE: loop exit
PB: predicated region body
PF: predicated region fallthrough
CT: control target
= control target key end

     0   :  { %7 = vsyncpa [#allocation3], 0  ;;  %s852_s0 = inlined_call_operand.hbm [shape: f32[32,128], index: 0, kind: input, shape index: {}]   ;;  %s853_s1 = inlined_call_operand.hbm [shape: f32[32,128], index: 1, kind: input, shape index: {}]   ;;  %s854_s2 = inlined_call_operand.hbm [shape: f32[2,1,128], index: 2, kind: output, shape index: {}]  }
   0x1   :  { %9 = vsyncpa [#allocation3 + $0x1], 0 }
   0x2   :  { %10 = vsyncpa [#allocation6], 0 }
   0x3   :  { %12 = vsyncpa [#allocation6 + $0x1], 0 }
   0x4   :  { %13 = vsyncpa [#allocation4], 0 }
   0x5   :  { %15 = vsyncpa [#allocation4 + $0x1], 0  ;;  %s632_s9 = smov 0   ;;  %s634_s10 = smov 0  }
   0x6   :  { %s636_s11 = smov 0   ;;  %s638_s12 = smov 0  }
   0x7 LB: > { %s653_s13 = sadd.s32 4294967295, %s607_s12   ;;  %s407_s14 = sadd.s32 4294967294, %s607_s12   ;;  %s607_s12 = sphi %s638_s12, %s870_s12   ;;  %s603_s11 = sphi %s636_s11, %s869_s11   ;;  %s599_s10 = sphi %s634_s10, %s868_s10   ;;  %s595_s9 = sphi %s632_s9, %s867_s9  }
   0x8   : > { %s657_s15 = sadd.s32 1, %s607_s12   ;;  %s28_s16 = sadd.s32 1, %s603_s11 }
   0x9   : > { %s25_s17 = ssub.s32 %s607_s12, %s657_s15  ;;  %p35_p0 = scmp.ne.s32.totalorder %s603_s11, %s599_s10 }
   0xa   : > { %p26_p1 = scmp.eq.s32.totalorder %s25_s17, 0  ;;  %p36_p2 = scmp.eq.s32.totalorder %s607_s12, 0 }
   0xb   : > { %p41_p3 = scmp.ne.s32.totalorder %s599_s10, %s595_s9  ;;  %p42_p4 = scmp.eq.s32.totalorder %s653_s13, 0 }
   0xc   : > { %s669_s18 = scalar_select %p26_p1, %s603_s11, %s28_s16  }
   0xd   : > { %p671_p5 = por %p36_p2, %p35_p0  ;;  %p675_p6 = por %p42_p4, %p41_p3 }
   0xe   : > { %p91_p7 = scmp.eq.s32.totalorder %s653_s13, 1  ;;  %p97_p8 = scmp.eq.s32.totalorder %s407_s14, 1 }
   0xf   : > { %s858_s20 = scalar_select %p675_p6, 1, 0 }
  0x10   : > { %p444_p10 = scmp.lt.s32.totalorder %s607_s12, 2  ;;  %p682_p11 = por %p91_p7, %p35_p0 }
  0x11   : > { %p686_p12 = por %p97_p8, %p41_p3  ;;  %s691_s23 = sand.u32 1, %s603_s11  }
  0x12   : > { %s859_s21 = scalar_select %p682_p11, 1, 0 }
  0x13   : > { %s860_s22 = scalar_select %p686_p12, 1, 0 }
  0x14   : > { %s425_s24 = sshll.u32 %s607_s12, 8  ;;  %s410_s25 = sshll.u32 %s691_s23, 4 }
  0x15   : > { %s700_s28 = scalar_lea.hbm %s852_s0, %s425_s24  ;;  %s121_s29 = scalar_lea.vmem [#allocation2], %s410_s25 }
  0x16   : > { %s128_s30 = sshll.u32 %s121_s29, 4  ;;  %p706_p13 = pnand %p444_p10, %p671_p5  ;;  %s710_s30 = int_to_ptr.vmem [resolvable:$true] %s128_s30 }
  0x17   : > { %s118_s4 = scalar_lea.sflag [#allocation3], %s691_s23  ;;  %s483_s5 = scalar_lea.hbm %s700_s28, 256 }
  0x18   : > { %p484_p0 = scmp.ne.s32.totalorder %s700_s28, %s483_s5  ;;  %p485_p1 = pneg %p706_p13 }
  0x19   : > { %s488_s8 = scalar_lea.hbm %s852_s0, 512  ;;  %p489_p4 = scmp.lt.s32.totalorder %s700_s28, %s852_s0 }
  0x1a   : > { %p486_p2 = pnand %p485_p1, %p484_p0  ;;  %p490_p5 = scmp.lt.s32.totalorder %s488_s8, %s483_s5 }
  0x1c   : > { %p487_p3 = pneg %p486_p2  ;;  %p491_p7 = por %p490_p5, %p489_p4 }
  0x1e   : > { %p492_p8 = pnand %p491_p7, %p487_p3 }
  0x20   : > { %495 = shalt.err (!%p492_p8)
}
  0x21   : > { %s496_s17 = scalar_lea.vmem %s710_s30, 256  ;;  %s609_s19 = smov [#allocation2]  }
  0x22   : > { %p497_p10 = scmp.ne.s32.totalorder %s710_s30, %s496_s17  ;;  %s501_s26 = sshll.u32 %s609_s19, 4  ;;  %s502_s26 = int_to_ptr.vmem [resolvable:$false] %s501_s26 }
  0x23   : > { %s503_s27 = scalar_lea.vmem %s502_s26, 512  ;;  %p504_p9 = scmp.lt.s32.totalorder %s710_s30, %s502_s26 }
  0x24   : > { %p499_p0 = pnand %p497_p10, %p485_p1  ;;  %p505_p12 = scmp.lt.s32.totalorder %s503_s27, %s496_s17 }
  0x26   : > { %p500_p2 = pneg %p499_p0  ;;  %p506_p11 = por %p505_p12, %p504_p9 }
  0x28   : > { %p507_p4 = pnand %p506_p11, %p500_p2 }
  0x2a   : > { %510 = shalt.err (!%p507_p4)
}
  0x2b   : > { %s610_s29 = smov 128   ;;  %s611_s5 = smov 8  }
  0x2c   : > { %436 = dma.hbm_to_vmem [thread:$0]  (!%p706_p13), %s700_s28, 256, %s710_s30, %s118_s4, %s610_s29, %s610_s29, %s611_s5  }
  0x2d   : > { %p416_p9 = scmp.ge.s32.totalorder %s607_s12, 1  ;;  %p157_p11 = scmp.lt.s32.totalorder %s607_s12, 3 }
  0x2e   : > { %s753_s14 = scalar_lea.hbm %s853_s1, %s425_s24  ;;  %s142_s16 = scalar_lea.vmem [#allocation5], %s410_s25 }
  0x2f   : > { %p744_p12 = pnand %p416_p9, %p157_p11  ;;  %s149_s17 = sshll.u32 %s142_s16, 4  ;;  %s757_s17 = int_to_ptr.vmem [resolvable:$true] %s149_s17 }
  0x30   : > { %s139_s28 = scalar_lea.sflag [#allocation6], %s691_s23  ;;  %s511_s30 = scalar_lea.hbm %s753_s14, 256 }
  0x31   : > { %p512_p3 = scmp.ne.s32.totalorder %s753_s14, %s511_s30  ;;  %s516_s24 = scalar_lea.hbm %s853_s1, 512 }
  0x32   : > { %p517_p8 = scmp.lt.s32.totalorder %s753_s14, %s853_s1  ;;  %p518_p10 = scmp.lt.s32.totalorder %s516_s24, %s511_s30 }
  0x33   : > { %p514_p5 = pnand %p512_p3, %p485_p1 }
  0x34   : > { %p519_p0 = por %p518_p10, %p517_p8 }
  0x35   : > { %p515_p7 = pneg %p514_p5 }
  0x37   : > { %p520_p2 = pnand %p519_p0, %p515_p7 }
  0x39   : > { %523 = shalt.err (!%p520_p2)
}
  0x3a   : > { %s524_s23 = scalar_lea.vmem %s757_s17, 256  ;;  %s612_s25 = smov [#allocation5]  }
  0x3b   : > { %p525_p4 = scmp.ne.s32.totalorder %s757_s17, %s524_s23  ;;  %s529_s7 = sshll.u32 %s612_s25, 4  ;;  %s530_s7 = int_to_ptr.vmem [resolvable:$false] %s529_s7 }
  0x3c   : > { %s531_s8 = scalar_lea.vmem %s530_s7, 512  ;;  %p532_p3 = scmp.lt.s32.totalorder %s757_s17, %s530_s7 }
  0x3d   : > { %p527_p9 = pnand %p525_p4, %p485_p1  ;;  %p533_p5 = scmp.lt.s32.totalorder %s531_s8, %s524_s23 }
  0x3f   : > { %p528_p11 = pneg %p527_p9  ;;  %p534_p6 = por %p533_p5, %p532_p3 }
  0x41   : > { %p535_p8 = pnand %p534_p6, %p528_p11 }
  0x43   : > { %538 = shalt.err (!%p535_p8)
}
  0x44   : > { %439 = dma.hbm_to_vmem [thread:$0]  (!%p706_p13), %s753_s14, 256, %s757_s17, %s139_s28, %s610_s29, %s610_s29, %s611_s5  }
  0x45   : > { %161 = sbr.rel (%p744_p12) target bundleno = 244 (0xf4), region = 28  ;;  %s788_s16 = sand.u32 (!%p744_p12), 1, %s599_s10  }
  0x46   : > { %s417_s30 = sshll.u32 (!%p744_p12), %s788_s16, 4  ;;  %s164_s4 = scalar_lea.sflag (!%p744_p12), [#allocation3], %s788_s16 }
  0x47   : > { %s167_s19 = scalar_lea.vmem (!%p744_p12), [#allocation2], %s417_s30  ;;  %p863_p6 = scmp.ne.s32.totalorder (!%p744_p12), %s858_s20, 0 }
  0x4a   : > { %582 = dma.done.wait (%p863_p6), %s164_s4, 256  }
  0x4b   : > { %584 = vsyncadd (%p863_p6), %s164_s4, 4294967040  ;;  %s173_s3 = scalar_lea.sflag [#allocation6], %s788_s16  ;;  %s176_s29 = scalar_lea.vmem [#allocation5], %s417_s30 }
  0x4c   : > { %586 = dma.done.wait (%p863_p6), %s173_s3, 256  }
  0x4d   : > { %588 = vsyncadd (%p863_p6), %s173_s3, 4294967040  ;;  %v207_v0 = vlaneseq  ;;  %v203_v3 = vld [vmem:[%s167_s19] sm:$0xff]  ;;  %v204_v4 = vld [vmem:[%s167_s19 + $0x8] sm:$0xff]  ;;  %v613_v5 = vmov 0.0   ;;  %s614_s5 = smov 1   ;;  %s615_s20 = smov 127  }
  0x4e   : > { %226 = vrot.lane.b32.xlu1 %v203_v3, %s614_s5  ;;  %v248_v8 = vrot.slane %v203_v3, 1  ;;  %v255_v9 = vrot.slane %v203_v3, 7  ;;  %222 = vrot.lane.b32.xlu0 %v203_v3, %s615_s20  ;;  %v249_v10 = vrot.slane %v204_v4, 1  ;;  %v256_v11 = vrot.slane %v204_v4, 7  ;;  %v206_v12 = vld [vmem:[%s176_s29 + $0x8] sm:$0xff]  ;;  %v205_v13 = vld [vmem:[%s176_s29] sm:$0xff] }
  0x4f   : > { %v208_v1 = vshrl.u32 %v207_v0, 7  ;;  %v267_v14 = vrot.slane %v206_v12, 1  ;;  %v273_v15 = vrot.slane %v206_v12, 7  ;;  %v266_v16 = vrot.slane %v205_v13, 1  ;;  %s422_s6 = sshll.u32 %s653_s13, 4  ;;  %s200_s14 = scalar_lea.vmem [#allocation7], %s788_s16 }
  0x50   : > { %v272_v17 = vrot.slane %v205_v13, 7  ;;  %v291_v48 = vand.u32 127, %v207_v0  ;;  %s318_s17 = sshll.u32 %s200_s14, 4  ;;  %s316_s26 = scalar_lea.hbm %s854_s2, %s422_s6  ;;  %s319_s17 = int_to_ptr.vmem [resolvable:$true] %s318_s17 }
  0x51   : > { %v209_v2 = vadd.s32 8, %v208_v1  ;;  %vm216_vm0 = vcmp.gt.s32.totalorder %v208_v1, 0  ;;  %vm250_vm2 = vcmp.lt.s32.totalorder %v208_v1, 7  ;;  %vm257_vm3 = vcmp.lt.s32.totalorder %v208_v1, 1  ;;  %s306_s27 = scalar_lea.sflag [#allocation4], %s788_s16  ;;  %s539_s23 = scalar_lea.vmem %s319_s17, 16 }
  0x52   : > { %v420_v7 = vsel %vm216_vm0, 1.0, %v613_v5  ;;  %v252_v18 = vsel %vm250_vm2, %v249_v10, %v248_v8  ;;  %v259_v19 = vsel %vm257_vm3, %v256_v11, %v255_v9  ;;  %v258_v20 = vsel %vm257_vm3, %v255_v9, %v256_v11  ;;  %228 = vrot.lane.b32.xlu1 %v204_v4, %s614_s5  ;;  %224 = vrot.lane.b32.xlu0 %v204_v4, %s615_s20  ;;  %p540_p13 = scmp.ne.s32.totalorder %s319_s17, %s539_s23  ;;  %p864_p1 = scmp.ne.s32.totalorder %s859_s21, 0 }
  0x53   : > { %vm211_vm1 = vcmp.lt.s32.totalorder %v209_v2, 15  ;;  %v251_v21 = vsel %vm250_vm2, %v248_v8, %v249_v10  ;;  %v269_v22 = vsel %vm250_vm2, %v267_v14, %v266_v16  ;;  %v275_v23 = vsel %vm257_vm3, %v273_v15, %v272_v17  ;;  %s616_s25 = smov [#allocation7]  }
  0x54   : > { %v419_v6 = vsel %vm211_vm1, 1.0, %v613_v5  ;;  %v274_v24 = vsel %vm257_vm3, %v272_v17, %v273_v15  ;;  %v268_v27 = vsel %vm250_vm2, %v266_v16, %v267_v14  ;;  %v276_v28 = vmul.f32 %v420_v7, %v275_v23  ;;  %p541_p12 = pnand %p540_p13, %p864_p1  ;;  %s543_s7 = sshll.u32 %s616_s25, 4  ;;  %s544_s7 = int_to_ptr.vmem [resolvable:$false] %s543_s7 }
  0x55   : > { %v254_v25 = vmul.f32 %v419_v6, %v252_v18  ;;  %v271_v26 = vmul.f32 %v419_v6, %v269_v22  ;;  %v260_v30 = vmul.f32 %v420_v7, %v259_v19  ;;  %vm292_vm4 = vcmp.lt.s32.totalorder %v291_v48, 16  ;;  %s545_s13 = scalar_lea.vmem %s544_s7, 32  ;;  %p546_p10 = scmp.lt.s32.totalorder %s319_s17, %s544_s7 }
  0x56   : > { %v278_v32 = vsub.f32 %v268_v27, %v276_v28  ;;  %236 = vrot.lane.b32.xlu1 %v206_v12, %s615_s20  ;;  %234 = vrot.lane.b32.xlu0 %v205_v13, %s615_s20  ;;  %v421_v63 = vsel %vm292_vm4, 1.0, %v613_v5  ;;  %p542_p7 = pneg %p541_p12  ;;  %p547_p0 = scmp.lt.s32.totalorder %s545_s13, %s539_s23 }
  0x57   : > { %v263_v29 = vsub.f32 %v254_v25, %v258_v20  ;;  %v279_v31 = vsub.f32 %v271_v26, %v274_v24  ;;  %v262_v34 = vsub.f32 %v251_v21, %v260_v30 }
  0x58   : > { %v280_v36 = vand.u32 2147483647, %v278_v32  ;;  %p548_p2 = por %p547_p0, %p546_p10 }
  0x59   : > { %v265_v33 = vand.u32 2147483647, %v263_v29  ;;  %v281_v35 = vand.u32 2147483647, %v279_v31  ;;  %v264_v37 = vand.u32 2147483647, %v262_v34 }
  0x5a   : > { %240 = vrot.lane.b32.xlu1 %v206_v12, %s614_s5  ;;  %238 = vrot.lane.b32.xlu0 %v205_v13, %s614_s5  ;;  %p549_p4 = pnand %p548_p2, %p542_p7 }
  0x5b   : > { %v283_v38 = vsub.f32 %v265_v33, %v281_v35  ;;  %v282_v39 = vsub.f32 %v264_v37, %v280_v36 }
  0x5d   : > { %v287_v58 = vmul.f32 %v283_v38, %v283_v38  ;;  %v286_v60 = vmul.f32 %v282_v39, %v282_v39 }
  0xc0   : > { %v227_v40 = vpop.permute.xlu1 %226  ;;  %v223_v41 = vpop.permute.xlu0 %222 }
  0xc1   : > { %v230_v46 = vsub.f32 %v223_v41, %v227_v40 }
  0xc3   : > { %v232_v53 = vand.u32 2147483647, %v230_v46 }
  0xc4   : > { %v229_v42 = vpop.permute.xlu1 %228  ;;  %v225_v43 = vpop.permute.xlu0 %224 }
  0xc5   : > { %v231_v47 = vsub.f32 %v225_v43, %v229_v42 }
  0xc7   : > { %v233_v54 = vand.u32 2147483647, %v231_v47 }
  0xc8   : > { %v237_v44 = vpop.permute.xlu1 %236  ;;  %v235_v45 = vpop.permute.xlu0 %234 }
  0xcc   : > { %v241_v49 = vpop.permute.xlu1 %240  ;;  %v239_v50 = vpop.permute.xlu0 %238 }
  0xcd   : > { %v243_v51 = vsub.f32 %v237_v44, %v241_v49  ;;  %v242_v52 = vsub.f32 %v235_v45, %v239_v50 }
  0xcf   : > { %v245_v55 = vand.u32 2147483647, %v243_v51  ;;  %v244_v56 = vand.u32 2147483647, %v242_v52 }
  0xd1   : > { %v247_v57 = vsub.f32 %v233_v54, %v245_v55  ;;  %v246_v59 = vsub.f32 %v232_v53, %v244_v56 }
  0xd3   : > { %v285_v61 = vmul.f32 %v247_v57, %v247_v57  ;;  %v284_v62 = vmul.f32 %v246_v59, %v246_v59 }
  0xd5   : > { %v289_v0 = vadd.f32 %v287_v58, %v285_v61  ;;  %v288_v1 = vadd.f32 %v286_v60, %v284_v62 }
  0xd7   : > { %v296_v2 = vmul.f32 %v421_v63, %v289_v0  ;;  %v295_v3 = vmul.f32 %v421_v63, %v288_v1 }
  0xd9   : > { %v297_v4 = vadd.f32 %v296_v2, %v295_v3 }
  0xdb   : > { %v298_v6 = vrot.slane %v297_v4, 4 }
  0xdd   : > { %v299_v7 = vadd.f32 %v298_v6, %v297_v4 }
  0xdf   : > { %v300_v8 = vrot.slane %v299_v7, 2 }
  0xe1   : > { %v301_v9 = vadd.f32 %v300_v8, %v299_v7 }
  0xe3   : > { %v302_v10 = vrot.slane %v301_v9, 1 }
  0xe5   : > { %v303_v11 = vadd.f32 %v302_v10, %v301_v9 }
  0xe7   : > { %304 = vst [vmem:[%s200_s14] sm:$0x1] %v303_v11 }
  0xe8   : > { %552 = shalt.err (!%p549_p4)
}
  0xe9   : > { %s553_s8 = scalar_lea.hbm %s316_s26, 16  ;;  %s557_s4 = scalar_lea.hbm %s854_s2, 32 }
  0xea   : > { %p554_p9 = scmp.ne.s32.totalorder %s316_s26, %s553_s8  ;;  %p558_p5 = scmp.lt.s32.totalorder %s316_s26, %s854_s2 }
  0xeb   : > { %p559_p8 = scmp.lt.s32.totalorder %s557_s4, %s553_s8 }
  0xec   : > { %p555_p11 = pnand %p554_p9, %p864_p1 }
  0xed   : > { %p560_p6 = por %p559_p8, %p558_p5 }
  0xee   : > { %p556_p3 = pneg %p555_p11 }
  0xf0   : > { %p561_p13 = pnand %p560_p6, %p556_p3 }
  0xf2   : > { %564 = shalt.err (!%p561_p13)
}
  0xf3   : > { %431 = dma.vmem_to_hbm [thread:$0]  (%p864_p1), %s319_s17, 16, %s316_s26, %s306_s27  }
  0xf4 PF: > { %s330_s29 = sand.u32 1, %s595_s9   ;;  %p865_p12 = scmp.ne.s32.totalorder %s860_s22, 0 }
  0xf5   : > { %p866_p7 = scmp.ge.s32.totalorder %s607_s12, 2  ;;  %s331_s5 = scalar_lea.sflag [#allocation4], %s330_s29 }
  0xf7   : > { %p441_p10 = pnand %p866_p7, %p865_p12 }
  0xf9   : > { %p442_p0 = pneg %p441_p10 }
  0xfb   : > { %590 = dma.done.wait (%p442_p0), %s331_s5, 16  }
  0xfc   : > { %592 = vsyncadd (%p442_p0), %s331_s5, 4294967280  ;;  %p18_p2 = scmp.ge.s32.totalorder %s657_s15, 4   ;;  %s867_s9 = smov %s599_s10 }
  0xfd   : > { %s868_s10 = smov %s603_s11  ;;  %s869_s11 = smov %s669_s18 }
  0xfe   : > { %s870_s12 = smov %s657_s15  ;;  %20 = sbr.rel (!%p18_p2) target bundleno = 7 (0x7), region = 86 }
 0x103   :  { %335 = vsyncpa [#allocation3], 1 }
 0x104   :  { %337 = vsyncpa [#allocation3 + $0x1], 1 }
 0x105   :  { %338 = vsyncpa [#allocation6], 1 }
 0x106   :  { %340 = vsyncpa [#allocation6 + $0x1], 1 }
 0x107   :  { %341 = vsyncpa [#allocation4], 1 }
 0x108   :  { %343 = vsyncpa [#allocation4 + $0x1], 1 }

</bundles_post_ra>
